<compile_context>
chip_gen: v7x
topology: tpu7x:2x2x1
jax: 0.10.0
libtpu: 0.0.40
codegen_flags: <defaults>
</compile_context>

<pallas_src>
import functools

import jax
import jax.numpy as jnp
from jax.experimental import pallas as pl
from jax.experimental.pallas import tpu as pltpu


def _round_up(x, m):
    return ((x + m - 1) // m) * m


# ----------------------------------------------------------------------------
# Pass 1: BatchNorm batch statistics (gridded reduction over batch tiles).
# ----------------------------------------------------------------------------
def bn_stats_kernel(state_ref, stats_ref, *, batch_size, eps):
    i = pl.program_id(0)

    @pl.when(i == 0)
    def _():
        stats_ref[...] = jnp.zeros_like(stats_ref)

    x = state_ref[...]                                   # (bt, Sp) f32; padded rows are 0
    s = jnp.sum(x, axis=0, keepdims=True)                # (1, Sp)
    sq = jnp.sum(x * x, axis=0, keepdims=True)           # (1, Sp)
    stats_ref[0:1, :] = stats_ref[0:1, :] + s
    stats_ref[1:2, :] = stats_ref[1:2, :] + sq

    @pl.when(i == pl.num_programs(0) - 1)
    def _():
        total = stats_ref[0:1, :]
        total_sq = stats_ref[1:2, :]
        inv_n = 1.0 / float(batch_size)
        mean = total * inv_n
        var = jnp.maximum(total_sq * inv_n - mean * mean, 0.0)   # biased variance
        stats_ref[0:1, :] = mean
        stats_ref[1:2, :] = jax.lax.rsqrt(var + eps)


# ----------------------------------------------------------------------------
# Pass 2: normalized MLP forward, one batch tile per grid step.
# ----------------------------------------------------------------------------
def critic_kernel(state_ref, action_ref, bn_ref, w1_ref, w2_ref, w3_ref, bias_ref,
                  out_ref, *, f1p, f2p, out_p):
    # --- BatchNorm1d using precomputed batch stats (f32, VPU) ---
    mean = bn_ref[0:1, :]
    inv_std = bn_ref[1:2, :]
    x = (state_ref[...] - mean) * inv_std

    # --- fc1 + relu (bf16 MXU inputs, f32 accumulation) ---
    b1 = bias_ref[0:1, 0:f1p]
    h1 = jnp.dot(x.astype(jnp.bfloat16), w1_ref[...],
                 preferred_element_type=jnp.float32) + b1
    h1 = jnp.maximum(h1, 0.0)

    # --- concat(h1, action) @ W2 + b2  ==  h1 @ W2a + action @ W2b + b2 ---
    b2 = bias_ref[1:2, 0:f2p]
    h2 = (jnp.dot(h1.astype(jnp.bfloat16), w2_ref[0:f1p, :],
                  preferred_element_type=jnp.float32)
          + jnp.dot(action_ref[...].astype(jnp.bfloat16), w2_ref[f1p:, :],
                    preferred_element_type=jnp.float32)
          + b2)
    h2 = jnp.maximum(h2, 0.0)

    # --- output head: W3 padded to 128 lanes -> lane-dense (tile, 128) store ---
    b3 = bias_ref[2:3, 0:out_p]
    out = jnp.dot(h2.astype(jnp.bfloat16), w3_ref[...],
                  preferred_element_type=jnp.float32) + b3
    out_ref[...] = out.astype(out_ref.dtype)


# ----------------------------------------------------------------------------
# Wrapper
# ----------------------------------------------------------------------------
def critic_forward(state, action, params, *, block_b=512):
    """state: (B, state_dim), action: (B, action_dim) -> (B, 1) float32."""
    dims = params["dims"]
    B, state_dim = state.shape
    action_dim = action.shape[1]
    assert state_dim == dims["state_dim"] and action_dim == dims["action_dim"]

    Sp, Ap = dims["Sp"], dims["Ap"]
    F1p, F2p, OUTp = dims["F1p"], dims["F2p"], dims["OUTp"]
    maxw = params["biases"].shape[1]

    # Batch tiling: multiple of 8 sublanes; pad the batch with zero rows
    # (zero rows do not perturb the BN sums; we divide by the true B).
    bt = min(block_b, _round_up(B, 8))
    n_tiles = pl.cdiv(B, bt)
    Bp = n_tiles * bt

    state_p = jnp.zeros((Bp, Sp), jnp.float32).at[:B, :state_dim].set(
        state.astype(jnp.float32))
    action_p = jnp.zeros((Bp, Ap), jnp.float32).at[:B, :action_dim].set(
        action.astype(jnp.float32))

    vmem_cap = 32 * 1024 * 1024  # explicit, portable across v5e/v6e/v7x defaults
    cp_reduce = pltpu.CompilerParams(dimension_semantics=("arbitrary",),
                                     vmem_limit_bytes=vmem_cap)
    cp_parallel = pltpu.CompilerParams(dimension_semantics=("parallel",),
                                       vmem_limit_bytes=vmem_cap)

    # Pass 1: batch mean / inv_std.
    stats = pl.pallas_call(
        functools.partial(bn_stats_kernel, batch_size=B, eps=1e-5),
        grid=(n_tiles,),
        in_specs=[pl.BlockSpec((bt, Sp), lambda i: (i, 0))],
        out_specs=pl.BlockSpec((8, Sp), lambda i: (0, 0)),
        out_shape=jax.ShapeDtypeStruct((8, Sp), jnp.float32),
        compiler_params=cp_reduce,
    )(state_p)

    # Pass 2: the MLP, batch tiles independent -> "parallel" (megacore on v7x).
    out_padded = pl.pallas_call(
        functools.partial(critic_kernel, f1p=F1p, f2p=F2p, out_p=OUTp),
        grid=(n_tiles,),
        in_specs=[
            pl.BlockSpec((bt, Sp), lambda i: (i, 0)),          # state tile
            pl.BlockSpec((bt, Ap), lambda i: (i, 0)),          # action tile
            pl.BlockSpec((8, Sp), lambda i: (0, 0)),           # BN stats (resident)
            pl.BlockSpec((Sp, F1p), lambda i: (0, 0)),         # W1 (resident)
            pl.BlockSpec((F1p + Ap, F2p), lambda i: (0, 0)),   # W2 (resident)
            pl.BlockSpec((F2p, OUTp), lambda i: (0, 0)),       # W3 (resident)
            pl.BlockSpec((8, maxw), lambda i: (0, 0)),         # packed biases
        ],
        out_specs=pl.BlockSpec((bt, OUTp), lambda i: (i, 0)),
        out_shape=jax.ShapeDtypeStruct((Bp, OUTp), jnp.float32),
        compiler_params=cp_parallel,
    )(state_p, action_p, stats, params["w1"], params["w2"], params["w3"],
      params["biases"])

    return out_padded[:B, :1]


# ----------------------------------------------------------------------------
# Parameter init (mirrors init_weights: xavier_uniform weights, bias = 0.01)
# ----------------------------------------------------------------------------
def xavier_uniform(key, fan_in, fan_out, dtype=jnp.float32):
    limit = jnp.sqrt(6.0 / (fan_in + fan_out))
    return jax.random.uniform(key, (fan_in, fan_out), dtype,
                              minval=-limit, maxval=limit)


def init_critic_params(key, state_dim, action_dim, fc1_units, fc2_units,
                       weight_dtype=jnp.bfloat16):
    k1, k2, k3 = jax.random.split(key, 3)

    Sp = _round_up(state_dim, 128)
    Ap = _round_up(action_dim, 128)
    F1p = _round_up(fc1_units, 128)
    F2p = _round_up(fc2_units, 128)
    OUTp = 128  # lane-dense output slab; real column is 0

    # Raw f32 weights, stored (in, out) so the kernels compute x @ W + b.
    w1 = xavier_uniform(k1, state_dim, fc1_units)
    w2 = xavier_uniform(k2, fc1_units + action_dim, fc2_units)
    w3 = xavier_uniform(k3, fc2_units, 1)

    # Zero-padded, bf16 copies for the MXU.
    w1_p = jnp.zeros((Sp, F1p), jnp.float32).at[:state_dim, :fc1_units].set(w1)
    w2_p = jnp.zeros((F1p + Ap, F2p), jnp.float32)
    w2_p = w2_p.at[:fc1_units, :fc2_units].set(w2[:fc1_units])
    w2_p = w2_p.at[F1p:F1p + action_dim, :fc2_units].set(w2[fc1_units:])
    w3_p = jnp.zeros((F2p, OUTp), jnp.float32).at[:fc2_units, :1].set(w3)

    maxw = max(F1p, F2p, OUTp)
    biases = jnp.zeros((8, maxw), jnp.float32)
    biases = biases.at[0, :fc1_units].set(0.01)   # b1
    biases = biases.at[1, :fc2_units].set(0.01)   # b2
    biases = biases.at[2, 0].set(0.01)            # b3

    return {
        "w1": w1_p.astype(weight_dtype),
        "w2": w2_p.astype(weight_dtype),
        "w3": w3_p.astype(weight_dtype),
        "biases": biases,
        "dims": dict(state_dim=state_dim, action_dim=action_dim,
                     fc1=fc1_units, fc2=fc2_units,
                     Sp=Sp, Ap=Ap, F1p=F1p, F2p=F2p, OUTp=OUTp),
        "raw": (w1, w2, w3),   # unpadded f32 weights, reference checks only
    }


# ----------------------------------------------------------------------------
# References
# ----------------------------------------------------------------------------
def critic_reference(state, action, params):
    """Pure-JAX reference that mirrors the kernel's padded/bf16 arithmetic."""
    dims = params["dims"]
    B = state.shape[0]
    Sp, Ap, F1p, F2p, OUTp = (dims["Sp"], dims["Ap"], dims["F1p"],
                              dims["F2p"], dims["OUTp"])
    bf = jnp.bfloat16

    state_p = jnp.zeros((B, Sp), jnp.float32).at[:, :dims["state_dim"]].set(state)
    action_p = jnp.zeros((B, Ap), jnp.float32).at[:, :dims["action_dim"]].set(action)

    mean = jnp.sum(state_p, axis=0, keepdims=True) / B
    sumsq = jnp.sum(state_p * state_p, axis=0, keepdims=True) / B
    var = jnp.maximum(sumsq - mean * mean, 0.0)
    x = (state_p - mean) * jax.lax.rsqrt(var + 1e-5)

    b = params["biases"]
    h1 = jnp.maximum(jnp.dot(x.astype(bf), params["w1"],
                             preferred_element_type=jnp.float32)
                     + b[0:1, :F1p], 0.0)
    h2 = jnp.maximum(jnp.dot(h1.astype(bf), params["w2"][:F1p],
                             preferred_element_type=jnp.float32)
                     + jnp.dot(action_p.astype(bf), params["w2"][F1p:],
                               preferred_element_type=jnp.float32)
                     + b[1:2, :F2p], 0.0)
    out = jnp.dot(h2.astype(bf), params["w3"],
                  preferred_element_type=jnp.float32) + b[2:3, :OUTp]
    return out[:, :1]


def critic_reference_f32(state, action, raw):
    """PyTorch-faithful full-precision reference (no padding, no bf16)."""
    w1, w2, w3 = raw
    eps = 1e-5
    mean = jnp.mean(state, axis=0, keepdims=True)
    var = jnp.mean((state - mean) ** 2, axis=0, keepdims=True)
    x = (state - mean) / jnp.sqrt(var + eps)
    h1 = jax.nn.relu(x @ w1 + 0.01)
    h2 = jax.nn.relu(jnp.concatenate([h1, action], axis=1) @ w2 + 0.01)
    return h2 @ w3 + 0.01


# ----------------------------------------------------------------------------
if __name__ == "__main__":
    batch = 12
    state_dim = 33
    action_dim = 4
    fc1_units = 64
    fc2_units = 48

    key = jax.random.PRNGKey(0)
    kp, ks, ka = jax.random.split(key, 3)

    params = init_critic_params(kp, state_dim, action_dim, fc1_units, fc2_units)
    state = jax.random.normal(ks, (batch, state_dim), jnp.float32)
    action = jax.random.normal(ka, (batch, action_dim), jnp.float32)

    fwd = jax.jit(lambda s, a: critic_forward(s, a, params))
    out = jax.block_until_ready(fwd(state, action))

    assert out.shape == (batch, 1), out.shape

    ref_exact = critic_reference(state, action, params)
    ref_f32 = critic_reference_f32(state, action, params["raw"])
    assert jnp.allclose(out, ref_exact, atol=1e-3, rtol=1e-3), (out, ref_exact)
    assert jnp.allclose(out, ref_f32, atol=5e-2, rtol=5e-2), (out, ref_f32)

    print("KERNEL_OK")
</pallas_src>

<mosaic_0001>
module attributes {stable_mosaic.version = 11 : i64} {
  func.func @bn_stats_kernel(%arg0: i32, %arg1: memref<16x128xf32, #tpu.memory_space<vmem>>, %arg2: memref<8x128xf32, #tpu.memory_space<vmem>>) attributes {dimension_semantics = [#tpu.dimension_semantics<arbitrary>], iteration_bounds = array<i64: 1>, scalar_prefetch = 0 : i64, scratch_operands = 0 : i64, tpu.core_type = #tpu.core_type<tc>, window_params = [{transform_indices = @transform_0, window_bounds = array<i64: 16, 128>}, {pipeline_mode = #tpu.pipeline_mode<synchronous>, transform_indices = @transform_1, window_bounds = array<i64: 8, 128>}]} {
    %c0_i32 = arith.constant 0 : i32
    %0 = arith.cmpi eq, %arg0, %c0_i32 : i32
    %1 = arith.extui %0 : i1 to i32
    %c0_i32_0 = arith.constant 0 : i32
    %2 = arith.cmpi ne, %1, %c0_i32_0 : i32
    scf.if %2 {
      %cst_12 = arith.constant 0.000000e+00 : f32
      %18 = vector.broadcast %cst_12 : f32 to vector<8x128xf32>
      %c0_13 = arith.constant 0 : index
      %c0_14 = arith.constant 0 : index
      %19 = vector.load %arg2[%c0_13, %c0_14] : memref<8x128xf32, #tpu.memory_space<vmem>>, vector<8x128xf32>
      tpu.vector_store %arg2[%c0_13, %c0_14], %18 {strides = array<i32>} : memref<8x128xf32, #tpu.memory_space<vmem>>, vector<8x128xf32>,
    } else {
    }
    %c0 = arith.constant 0 : index
    %c0_1 = arith.constant 0 : index
    %3 = vector.load %arg1[%c0, %c0_1] : memref<16x128xf32, #tpu.memory_space<vmem>>, vector<16x128xf32>
    %cst = arith.constant dense<0.000000e+00> : vector<128xf32>
    %4 = vector.multi_reduction <add>, %3, %cst [0] : vector<16x128xf32> to vector<128xf32>
    %5 = vector.shape_cast %4 : vector<128xf32> to vector<1x128xf32>
    %6 = arith.mulf %3, %3 : vector<16x128xf32>
    %cst_2 = arith.constant dense<0.000000e+00> : vector<128xf32>
    %7 = vector.multi_reduction <add>, %6, %cst_2 [0] : vector<16x128xf32> to vector<128xf32>
    %8 = vector.shape_cast %7 : vector<128xf32> to vector<1x128xf32>
    %c0_3 = arith.constant 0 : index
    %c0_4 = arith.constant 0 : index
    %9 = vector.load %arg2[%c0_3, %c0_4] : memref<8x128xf32, #tpu.memory_space<vmem>>, vector<1x128xf32>
    %10 = arith.addf %9, %5 : vector<1x128xf32>
    %c0_5 = arith.constant 0 : index
    %c0_6 = arith.constant 0 : index
    %11 = vector.load %arg2[%c0_5, %c0_6] : memref<8x128xf32, #tpu.memory_space<vmem>>, vector<1x128xf32>
    tpu.vector_store %arg2[%c0_5, %c0_6], %10 {strides = array<i32>} : memref<8x128xf32, #tpu.memory_space<vmem>>, vector<1x128xf32>,
    %c1 = arith.constant 1 : index
    %c0_7 = arith.constant 0 : index
    %12 = vector.load %arg2[%c1, %c0_7] : memref<8x128xf32, #tpu.memory_space<vmem>>, vector<1x128xf32>
    %13 = arith.addf %12, %8 : vector<1x128xf32>
    %c1_8 = arith.constant 1 : index
    %c0_9 = arith.constant 0 : index
    %14 = vector.load %arg2[%c1_8, %c0_9] : memref<8x128xf32, #tpu.memory_space<vmem>>, vector<1x128xf32>
    tpu.vector_store %arg2[%c1_8, %c0_9], %13 {strides = array<i32>} : memref<8x128xf32, #tpu.memory_space<vmem>>, vector<1x128xf32>,
    %c0_i32_10 = arith.constant 0 : i32
    %15 = arith.cmpi eq, %arg0, %c0_i32_10 : i32
    %16 = arith.extui %15 : i1 to i32
    %c0_i32_11 = arith.constant 0 : i32
    %17 = arith.cmpi ne, %16, %c0_i32_11 : i32
    scf.if %17 {
      %c0_12 = arith.constant 0 : index
      %c0_13 = arith.constant 0 : index
      %18 = vector.load %arg2[%c0_12, %c0_13] : memref<8x128xf32, #tpu.memory_space<vmem>>, vector<1x128xf32>
      %c1_14 = arith.constant 1 : index
      %c0_15 = arith.constant 0 : index
      %19 = vector.load %arg2[%c1_14, %c0_15] : memref<8x128xf32, #tpu.memory_space<vmem>>, vector<1x128xf32>
      %cst_16 = arith.constant 0.0833333358 : f32
      %20 = vector.broadcast %cst_16 : f32 to vector<1x128xf32>
      %21 = arith.mulf %18, %20 : vector<1x128xf32>
      %cst_17 = arith.constant 0.0833333358 : f32
      %22 = vector.broadcast %cst_17 : f32 to vector<1x128xf32>
      %23 = arith.mulf %19, %22 : vector<1x128xf32>
      %24 = arith.mulf %21, %21 : vector<1x128xf32>
      %25 = arith.subf %23, %24 : vector<1x128xf32>
      %cst_18 = arith.constant 0.000000e+00 : f32
      %26 = vector.broadcast %cst_18 : f32 to vector<1x128xf32>
      %27 = arith.maximumf %25, %26 : vector<1x128xf32>
      %c0_19 = arith.constant 0 : index
      %c0_20 = arith.constant 0 : index
      %28 = vector.load %arg2[%c0_19, %c0_20] : memref<8x128xf32, #tpu.memory_space<vmem>>, vector<1x128xf32>
      tpu.vector_store %arg2[%c0_19, %c0_20], %21 {strides = array<i32>} : memref<8x128xf32, #tpu.memory_space<vmem>>, vector<1x128xf32>,
      %cst_21 = arith.constant 9.99999974E-6 : f32
      %29 = vector.broadcast %cst_21 : f32 to vector<1x128xf32>
      %30 = arith.addf %27, %29 : vector<1x128xf32>
      %31 = math.rsqrt %30 : vector<1x128xf32>
      %c1_22 = arith.constant 1 : index
      %c0_23 = arith.constant 0 : index
      %32 = vector.load %arg2[%c1_22, %c0_23] : memref<8x128xf32, #tpu.memory_space<vmem>>, vector<1x128xf32>
      tpu.vector_store %arg2[%c1_22, %c0_23], %31 {strides = array<i32>} : memref<8x128xf32, #tpu.memory_space<vmem>>, vector<1x128xf32>,
    } else {
    }
    return
  }
  func.func @transform_0(%arg0: i32) -> (i32, i32) {
    %c0_i32 = arith.constant 0 : i32
    %c0_i32_0 = arith.constant 0 : i32
    return %arg0, %c0_i32 : i32, i32
  }
  func.func @transform_1(%arg0: i32) -> (i32, i32) {
    %c0_i32 = arith.constant 0 : i32
    %c0_i32_0 = arith.constant 0 : i32
    %c0_i32_1 = arith.constant 0 : i32
    return %c0_i32, %c0_i32_0 : i32, i32
  }
}

module attributes {stable_mosaic.version = 11 : i64} {
  func.func @critic_kernel(%arg0: i32, %arg1: memref<16x128xf32, #tpu.memory_space<vmem>>, %arg2: memref<16x128xf32, #tpu.memory_space<vmem>>, %arg3: memref<8x128xf32, #tpu.memory_space<vmem>>, %arg4: memref<128x128xbf16, #tpu.memory_space<vmem>>, %arg5: memref<256x128xbf16, #tpu.memory_space<vmem>>, %arg6: memref<128x128xbf16, #tpu.memory_space<vmem>>, %arg7: memref<8x128xf32, #tpu.memory_space<vmem>>, %arg8: memref<16x128xf32, #tpu.memory_space<vmem>>) attributes {dimension_semantics = [#tpu.dimension_semantics<parallel>], iteration_bounds = array<i64: 1>, scalar_prefetch = 0 : i64, scratch_operands = 0 : i64, tpu.core_type = #tpu.core_type<tc>, window_params = [{transform_indices = @transform_0, window_bounds = array<i64: 16, 128>}, {transform_indices = @transform_1, window_bounds = array<i64: 16, 128>}, {pipeline_mode = #tpu.pipeline_mode<synchronous>, transform_indices = @transform_2, window_bounds = array<i64: 8, 128>}, {pipeline_mode = #tpu.pipeline_mode<synchronous>, transform_indices = @transform_3, window_bounds = array<i64: 128, 128>}, {pipeline_mode = #tpu.pipeline_mode<synchronous>, transform_indices = @transform_4, window_bounds = array<i64: 256, 128>}, {pipeline_mode = #tpu.pipeline_mode<synchronous>, transform_indices = @transform_5, window_bounds = array<i64: 128, 128>}, {pipeline_mode = #tpu.pipeline_mode<synchronous>, transform_indices = @transform_6, window_bounds = array<i64: 8, 128>}, {transform_indices = @transform_7, window_bounds = array<i64: 16, 128>}]} {
    %c0 = arith.constant 0 : index
    %c0_0 = arith.constant 0 : index
    %0 = vector.load %arg3[%c0, %c0_0] : memref<8x128xf32, #tpu.memory_space<vmem>>, vector<1x128xf32>
    %c1 = arith.constant 1 : index
    %c0_1 = arith.constant 0 : index
    %1 = vector.load %arg3[%c1, %c0_1] : memref<8x128xf32, #tpu.memory_space<vmem>>, vector<1x128xf32>
    %c0_2 = arith.constant 0 : index
    %c0_3 = arith.constant 0 : index
    %2 = vector.load %arg1[%c0_2, %c0_3] : memref<16x128xf32, #tpu.memory_space<vmem>>, vector<16x128xf32>
    %3 = vector.broadcast %0 : vector<1x128xf32> to vector<16x128xf32>
    %4 = arith.subf %2, %3 : vector<16x128xf32>
    %5 = vector.broadcast %1 : vector<1x128xf32> to vector<16x128xf32>
    %6 = arith.mulf %4, %5 : vector<16x128xf32>
    %c0_4 = arith.constant 0 : index
    %c0_5 = arith.constant 0 : index
    %7 = vector.load %arg7[%c0_4, %c0_5] : memref<8x128xf32, #tpu.memory_space<vmem>>, vector<1x128xf32>
    %8 = arith.truncf %6 : vector<16x128xf32> to vector<16x128xbf16>
    %c0_6 = arith.constant 0 : index
    %c0_7 = arith.constant 0 : index
    %9 = vector.load %arg4[%c0_6, %c0_7] : memref<128x128xbf16, #tpu.memory_space<vmem>>, vector<128x128xbf16>
    %cst = arith.constant dense<0.000000e+00> : vector<16x128xf32>
    %10 = tpu.matmul %8, %9, %cst {dimension_numbers = #tpu.dot_dimension_numbers<[1], [0], [0], [1], [0, 0, 1, 1], [], []>} : vector<16x128xbf16>, vector<128x128xbf16>, vector<16x128xf32> -> vector<16x128xf32>
    %11 = vector.broadcast %7 : vector<1x128xf32> to vector<16x128xf32>
    %12 = arith.addf %10, %11 : vector<16x128xf32>
    %cst_8 = arith.constant 0.000000e+00 : f32
    %13 = vector.broadcast %cst_8 : f32 to vector<16x128xf32>
    %14 = arith.maximumf %12, %13 : vector<16x128xf32>
    %c1_9 = arith.constant 1 : index
    %c0_10 = arith.constant 0 : index
    %15 = vector.load %arg7[%c1_9, %c0_10] : memref<8x128xf32, #tpu.memory_space<vmem>>, vector<1x128xf32>
    %16 = arith.truncf %14 : vector<16x128xf32> to vector<16x128xbf16>
    %c0_11 = arith.constant 0 : index
    %c0_12 = arith.constant 0 : index
    %17 = vector.load %arg5[%c0_11, %c0_12] : memref<256x128xbf16, #tpu.memory_space<vmem>>, vector<128x128xbf16>
    %cst_13 = arith.constant dense<0.000000e+00> : vector<16x128xf32>
    %18 = tpu.matmul %16, %17, %cst_13 {dimension_numbers = #tpu.dot_dimension_numbers<[1], [0], [0], [1], [0, 0, 1, 1], [], []>} : vector<16x128xbf16>, vector<128x128xbf16>, vector<16x128xf32> -> vector<16x128xf32>
    %c0_14 = arith.constant 0 : index
    %c0_15 = arith.constant 0 : index
    %19 = vector.load %arg2[%c0_14, %c0_15] : memref<16x128xf32, #tpu.memory_space<vmem>>, vector<16x128xf32>
    %20 = arith.truncf %19 : vector<16x128xf32> to vector<16x128xbf16>
    %c128 = arith.constant 128 : index
    %c0_16 = arith.constant 0 : index
    %21 = vector.load %arg5[%c128, %c0_16] : memref<256x128xbf16, #tpu.memory_space<vmem>>, vector<128x128xbf16>
    %cst_17 = arith.constant dense<0.000000e+00> : vector<16x128xf32>
    %22 = tpu.matmul %20, %21, %cst_17 {dimension_numbers = #tpu.dot_dimension_numbers<[1], [0], [0], [1], [0, 0, 1, 1], [], []>} : vector<16x128xbf16>, vector<128x128xbf16>, vector<16x128xf32> -> vector<16x128xf32>
    %23 = arith.addf %18, %22 : vector<16x128xf32>
    %24 = vector.broadcast %15 : vector<1x128xf32> to vector<16x128xf32>
    %25 = arith.addf %23, %24 : vector<16x128xf32>
    %cst_18 = arith.constant 0.000000e+00 : f32
    %26 = vector.broadcast %cst_18 : f32 to vector<16x128xf32>
    %27 = arith.maximumf %25, %26 : vector<16x128xf32>
    %c2 = arith.constant 2 : index
    %c0_19 = arith.constant 0 : index
    %28 = vector.load %arg7[%c2, %c0_19] : memref<8x128xf32, #tpu.memory_space<vmem>>, vector<1x128xf32>
    %29 = arith.truncf %27 : vector<16x128xf32> to vector<16x128xbf16>
    %c0_20 = arith.constant 0 : index
    %c0_21 = arith.constant 0 : index
    %30 = vector.load %arg6[%c0_20, %c0_21] : memref<128x128xbf16, #tpu.memory_space<vmem>>, vector<128x128xbf16>
    %cst_22 = arith.constant dense<0.000000e+00> : vector<16x128xf32>
    %31 = tpu.matmul %29, %30, %cst_22 {dimension_numbers = #tpu.dot_dimension_numbers<[1], [0], [0], [1], [0, 0, 1, 1], [], []>} : vector<16x128xbf16>, vector<128x128xbf16>, vector<16x128xf32> -> vector<16x128xf32>
    %32 = vector.broadcast %28 : vector<1x128xf32> to vector<16x128xf32>
    %33 = arith.addf %31, %32 : vector<16x128xf32>
    %c0_23 = arith.constant 0 : index
    %c0_24 = arith.constant 0 : index
    %34 = vector.load %arg8[%c0_23, %c0_24] : memref<16x128xf32, #tpu.memory_space<vmem>>, vector<16x128xf32>
    tpu.vector_store %arg8[%c0_23, %c0_24], %33 {strides = array<i32>} : memref<16x128xf32, #tpu.memory_space<vmem>>, vector<16x128xf32>,
    return
  }
  func.func @transform_0(%arg0: i32) -> (i32, i32) {
    %c0_i32 = arith.constant 0 : i32
    %c0_i32_0 = arith.constant 0 : i32
    return %arg0, %c0_i32 : i32, i32
  }
  func.func @transform_1(%arg0: i32) -> (i32, i32) {
    %c0_i32 = arith.constant 0 : i32
    %c0_i32_0 = arith.constant 0 : i32
    return %arg0, %c0_i32 : i32, i32
  }
  func.func @transform_2(%arg0: i32) -> (i32, i32) {
    %c0_i32 = arith.constant 0 : i32
    %c0_i32_0 = arith.constant 0 : i32
    %c0_i32_1 = arith.constant 0 : i32
    return %c0_i32, %c0_i32_0 : i32, i32
  }
  func.func @transform_3(%arg0: i32) -> (i32, i32) {
    %c0_i32 = arith.constant 0 : i32
    %c0_i32_0 = arith.constant 0 : i32
    %c0_i32_1 = arith.constant 0 : i32
    return %c0_i32, %c0_i32_0 : i32, i32
  }
  func.func @transform_4(%arg0: i32) -> (i32, i32) {
    %c0_i32 = arith.constant 0 : i32
    %c0_i32_0 = arith.constant 0 : i32
    %c0_i32_1 = arith.constant 0 : i32
    return %c0_i32, %c0_i32_0 : i32, i32
  }
  func.func @transform_5(%arg0: i32) -> (i32, i32) {
    %c0_i32 = arith.constant 0 : i32
    %c0_i32_0 = arith.constant 0 : i32
    %c0_i32_1 = arith.constant 0 : i32
    return %c0_i32, %c0_i32_0 : i32, i32
  }
  func.func @transform_6(%arg0: i32) -> (i32, i32) {
    %c0_i32 = arith.constant 0 : i32
    %c0_i32_0 = arith.constant 0 : i32
    %c0_i32_1 = arith.constant 0 : i32
    return %c0_i32, %c0_i32_0 : i32, i32
  }
  func.func @transform_7(%arg0: i32) -> (i32, i32) {
    %c0_i32 = arith.constant 0 : i32
    %c0_i32_0 = arith.constant 0 : i32
    return %arg0, %c0_i32 : i32, i32
  }
}

</mosaic_0001>

<bundles_post_ra>
// kernel: _lambda_.2
= control target key start
LH: loop header
LB: loop body
LE: loop exit
PB: predicated region body
PF: predicated region fallthrough
CT: control target
= control target key end

     0   :  { %v58_v0 = vmov 0.0   ;;  %s102_s1 = inlined_call_operand.vmem [shape: f32[8,128], index: 1, kind: output, shape index: {}]   ;;  %s103_s0 = inlined_call_operand.vmem [shape: f32[16,128], index: 0, kind: input, shape index: {}]  }
   0x1   :  { %12 = vst [vmem:[%s102_s1] sm:$0xff] %v58_v0  ;;  %v13_v1 = vld [vmem:[%s103_s0] sm:$0xff]  ;;  %v14_v2 = vld [vmem:[%s103_s0 + $0x8] sm:$0xff] }
   0x2   :  { %v15_v3 = vadd.f32 %v14_v2, %v13_v1  ;;  %v22_v4 = vmul.f32 %v13_v1, %v13_v1  ;;  %v23_v5 = vmul.f32 %v14_v2, %v14_v2 }
   0x4   :  { %v16_v6 = vrot.slane %v15_v3, 4  ;;  %v24_v7 = vadd.f32 %v23_v5, %v22_v4 }
   0x6   :  { %v17_v8 = vadd.f32 %v16_v6, %v15_v3  ;;  %v25_v9 = vrot.slane %v24_v7, 4 }
   0x8   :  { %v18_v10 = vrot.slane %v17_v8, 2  ;;  %v26_v11 = vadd.f32 %v25_v9, %v24_v7  ;;  %v31_v16 = vld [vmem:[%s102_s1] sm:$0x1]  ;;  %v34_v21 = vld [vmem:[%s102_s1 + $0x1] sm:$0x1] }
   0xa   :  { %v19_v12 = vadd.f32 %v18_v10, %v17_v8  ;;  %v27_v13 = vrot.slane %v26_v11, 2 }
   0xc   :  { %v20_v14 = vrot.slane %v19_v12, 1  ;;  %v28_v15 = vadd.f32 %v27_v13, %v26_v11 }
   0xe   :  { %v21_v17 = vadd.f32 %v20_v14, %v19_v12  ;;  %v29_v18 = vrot.slane %v28_v15, 1 }
  0x10   :  { %v32_v19 = vadd.f32 %v31_v16, %v21_v17  ;;  %v30_v20 = vadd.f32 %v29_v18, %v28_v15 }
  0x12   :  { %33 = vst [vmem:[%s102_s1] sm:$0x1] %v32_v19  ;;  %v35_v22 = vadd.f32 %v34_v21, %v30_v20 }
  0x14   :  { %36 = vst [vmem:[%s102_s1 + $0x1] sm:$0x1] %v35_v22 }
  0x19   :  { %v40_v23 = vld [vmem:[%s102_s1] sm:$0x1] }
  0x1a   :  { %v42_v24 = vmul.f32 0.083333336, %v40_v23 }
  0x1b   :  { %v41_v25 = vld [vmem:[%s102_s1 + $0x1] sm:$0x1] }
  0x1c   :  { %v44_v26 = vmul.f32 %v42_v24, %v42_v24  ;;  %47 = vst [vmem:[%s102_s1] sm:$0x1] %v42_v24  ;;  %v43_v27 = vmul.f32 0.083333336, %v41_v25 }
  0x1e   :  { %v45_v28 = vsub.f32 %v43_v27, %v44_v26 }
  0x20   :  { %v46_v29 = vmax.f32 %v45_v28, 0.0 }
  0x22   :  { %v48_v30 = vadd.f32 1e-05, %v46_v29 }
  0x24   :  { %56 = vrsqrt.f32 %v48_v30 }
  0x2e   :  { %v57_v31 = vpop.eup %56 }
  0x2f   :  { %50 = vst [vmem:[%s102_s1 + $0x1] sm:$0x1] %v57_v31 }

// kernel: _lambda_.3
= control target key start
LH: loop header
LB: loop body
LE: loop exit
PB: predicated region body
PF: predicated region fallthrough
CT: control target
= control target key end

     0   :  { %12 = vsyncpa [#allocation3], 0  ;;  %s956_s0 = inlined_call_operand.vmem [shape: f32[16,128], index: 0, kind: input, shape index: {}]   ;;  %s957_s1 = inlined_call_operand.vmem [shape: f32[16,128], index: 1, kind: input, shape index: {}]   ;;  %s958_s2 = inlined_call_operand.vmem [shape: f32[8,128], index: 2, kind: input, shape index: {}]   ;;  %s959_s3 = inlined_call_operand.hbm [shape: bf16[128,128], index: 3, kind: input, shape index: {}]   ;;  %s960_s4 = inlined_call_operand.vmem [shape: bf16[256,128], index: 4, kind: input, shape index: {}]   ;;  %s961_s5 = inlined_call_operand.hbm [shape: bf16[128,128], index: 5, kind: input, shape index: {}]   ;;  %s962_s6 = inlined_call_operand.vmem [shape: f32[8,128], index: 6, kind: input, shape index: {}]   ;;  %s963_s7 = inlined_call_operand.vmem [shape: f32[16,128], index: 7, kind: output, shape index: {}]  }
   0x1   :  { %13 = vsyncpa [#allocation5], 0  ;;  %s765_s24 = smov [#allocation2]   ;;  %s717_s28 = scalar_lea.hbm %s959_s3, 1024 }
   0x2   :  { %s25_s25 = sshll.u32 %s765_s24, 4  ;;  %p718_p0 = scmp.ne.s32.totalorder %s959_s3, %s717_s28  ;;  %s26_s25 = int_to_ptr.vmem [resolvable:$true] %s25_s25 }
   0x3   :  { %p721_p1 = scmp.lt.u32.totalorder %s717_s28, %s959_s3 }
   0x5   :  { %p723_p2 = pnand %p721_p1, %p718_p0 }
   0x7   :  { %726 = shalt.err (!%p723_p2)
}
   0x8   :  { %s727_s10 = scalar_lea.vmem %s26_s25, 1024  ;;  %p732_p4 = scmp.lt.s32.totalorder %s26_s25, %s26_s25 }
   0x9   :  { %p728_p3 = scmp.ne.s32.totalorder %s26_s25, %s727_s10  ;;  %p733_p5 = scmp.lt.s32.totalorder %s727_s10, %s727_s10 }
   0xb   :  { %p734_p6 = por %p733_p5, %p732_p4 }
   0xd   :  { %p735_p7 = pnand %p734_p6, %p728_p3 }
   0xf   :  { %738 = shalt.err (!%p735_p7)
}
  0x10   :  { %s766_s11 = smov 64   ;;  %s767_s12 = smov 4  }
  0x11   :  { %31 = dma.hbm_to_vmem [thread:$0]  %s959_s3, 1024, %s26_s25, [#allocation3], %s766_s11, %s766_s11, %s767_s12  }
  0x12   :  { %s768_s15 = smov [#allocation4]   ;;  %s739_s19 = scalar_lea.hbm %s961_s5, 1024 }
  0x13   :  { %s39_s16 = sshll.u32 %s768_s15, 4  ;;  %p740_p8 = scmp.ne.s32.totalorder %s961_s5, %s739_s19  ;;  %s40_s16 = int_to_ptr.vmem [resolvable:$true] %s39_s16 }
  0x14   :  { %p743_p9 = scmp.lt.u32.totalorder %s739_s19, %s961_s5 }
  0x16   :  { %p745_p10 = pnand %p743_p9, %p740_p8 }
  0x18   :  { %748 = shalt.err (!%p745_p10)
}
  0x19   :  { %s749_s24 = scalar_lea.vmem %s40_s16, 1024  ;;  %p754_p12 = scmp.lt.s32.totalorder %s40_s16, %s40_s16 }
  0x1a   :  { %p750_p11 = scmp.ne.s32.totalorder %s40_s16, %s749_s24  ;;  %p755_p13 = scmp.lt.s32.totalorder %s749_s24, %s749_s24 }
  0x1c   :  { %p756_p0 = por %p755_p13, %p754_p12 }
  0x1e   :  { %p757_p1 = pnand %p756_p0, %p750_p11 }
  0x20   :  { %760 = shalt.err (!%p757_p1)
}
  0x21   :  { %45 = dma.hbm_to_vmem [thread:$0]  %s961_s5, 1024, %s40_s16, [#allocation5], %s766_s11, %s766_s11, %s767_s12  }
  0x22   :  { %761 = dma.done.wait [#allocation3], 1024  }
  0x23   :  { %762 = vsyncadd [#allocation3], 4294966272 }
  0x24   :  { %763 = dma.done.wait [#allocation5], 1024  }
  0x25   :  { %764 = vsyncadd [#allocation5], 4294966272  ;;  %v769_v0 = vmov 0.0   ;;  %vm770_vm0 = vmmov 0   ;;  %v685_v1 = vld [vmem:[#allocation2] sm:$0xff]   ;;  %v686_v2 = vld [vmem:[#allocation2 + $0x8] sm:$0xff]  }
  0x26   :  { %599 = vmatprep.subr.bf16.mxu0 %v769_v0  ;;  %615 = vmatprep.mubr.msk.bf16.mxu0 %vm770_vm0, %v769_v0  ;;  %v687_v3 = vld [vmem:[#allocation2 + $0x10] sm:$0xff]   ;;  %v688_v4 = vld [vmem:[#allocation2 + $0x18] sm:$0xff]   ;;  %v693_v5 = vld [vmem:[%s960_s4 + $0x40] sm:$0xff]  }
  0x27   :  { %619 = vmatprep.subr.bf16.mxu1 %v769_v0  ;;  %635 = vmatprep.mubr.msk.bf16.mxu1 %vm770_vm0, %v769_v0  ;;  %v695_v6 = vld [vmem:[%s960_s4 + $0x48] sm:$0xff]   ;;  %v689_v7 = vld [vmem:[#allocation2 + $0x20] sm:$0xff]   ;;  %v697_v10 = vld [vmem:[%s960_s4 + $0x50] sm:$0xff]  }
  0x28   :  { %600 = vmatpush3.bf16.msra.mxu0 %v685_v1  ;;  %620 = vmatpush3.bf16.msra.mxu1 %v693_v5  ;;  %v690_v8 = vld [vmem:[#allocation2 + $0x28] sm:$0xff]   ;;  %v526_v9 = vld [vmem:[%s958_s2] ss:$0 sm:$0xff]  ;;  %v699_v13 = vld [vmem:[%s960_s4 + $0x58] sm:$0xff]  }
  0x29   :  { %601 = vmatprep.subr.bf16.mxu0 %v769_v0  ;;  %621 = vmatprep.subr.bf16.mxu1 %v769_v0  ;;  %v57_v11 = vld [vmem:[%s956_s0] sm:$0xff]  ;;  %v58_v12 = vld [vmem:[%s956_s0 + $0x8] sm:$0xff]  ;;  %v691_v14 = vld [vmem:[#allocation2 + $0x30] sm:$0xff]  }
  0x2a   :  { %v63_v15 = vsub.f32 %v57_v11, %v526_v9  ;;  %v64_v16 = vsub.f32 %v58_v12, %v526_v9  ;;  %v527_v17 = vld [vmem:[%s958_s2 + $0x1] ss:$0 sm:$0xff]  ;;  %v692_v19 = vld [vmem:[#allocation2 + $0x38] sm:$0xff]   ;;  %v703_v22 = vld [vmem:[%s960_s4 + $0x68] sm:$0xff]  }
  0x2b   :  { %v701_v18 = vld [vmem:[%s960_s4 + $0x60] sm:$0xff]   ;;  %v705_v25 = vld [vmem:[%s960_s4 + $0x70] sm:$0xff]   ;;  %v696_v26 = vld [vmem:[%s960_s4 + $0x8] sm:$0xff]  }
  0x2c   :  { %602 = vmatpush3.bf16.msra.mxu0 %v686_v2  ;;  %622 = vmatpush3.bf16.msra.mxu1 %v695_v6  ;;  %v69_v20 = vmul.f32 %v527_v17, %v63_v15  ;;  %v70_v21 = vmul.f32 %v527_v17, %v64_v16  ;;  %v694_v24 = vld [vmem:[%s960_s4] sm:$0xff]   ;;  %v698_v27 = vld [vmem:[%s960_s4 + $0x10] sm:$0xff]   ;;  %v700_v28 = vld [vmem:[%s960_s4 + $0x18] sm:$0xff]  }
  0x2d   :  { %603 = vmatprep.subr.bf16.mxu0 %v769_v0  ;;  %623 = vmatprep.subr.bf16.mxu1 %v769_v0  ;;  %v702_v29 = vld [vmem:[%s960_s4 + $0x20] sm:$0xff]   ;;  %v704_v30 = vld [vmem:[%s960_s4 + $0x28] sm:$0xff]   ;;  %v706_v31 = vld [vmem:[%s960_s4 + $0x30] sm:$0xff]  }
  0x2e   :  { %v72_v23 = vpack.c.bf16 %v70_v21, %v69_v20  ;;  %v707_v32 = vld [vmem:[%s960_s4 + $0x78] sm:$0xff]   ;;  %v202_v33 = vld [vmem:[%s957_s1] sm:$0xff]  ;;  %v203_v34 = vld [vmem:[%s957_s1 + $0x8] sm:$0xff] }
  0x2f   :  { %v204_v35 = vpack.c.bf16 %v203_v34, %v202_v33  ;;  %v708_v36 = vld [vmem:[%s960_s4 + $0x38] sm:$0xff]   ;;  %v709_v37 = vld [vmem:[#allocation4] sm:$0xff]   ;;  %v710_v38 = vld [vmem:[#allocation4 + $0x8] sm:$0xff]  }
  0x30   :  { %604 = vmatpush3.bf16.msra.mxu0 %v687_v3  ;;  %624 = vmatpush3.bf16.msra.mxu1 %v697_v10  ;;  %v711_v39 = vld [vmem:[#allocation4 + $0x10] sm:$0xff]   ;;  %v712_v40 = vld [vmem:[#allocation4 + $0x18] sm:$0xff]   ;;  %v713_v41 = vld [vmem:[#allocation4 + $0x20] sm:$0xff]  }
  0x31   :  { %605 = vmatprep.subr.bf16.mxu0 %v769_v0  ;;  %625 = vmatprep.subr.bf16.mxu1 %v769_v0  ;;  %v528_v42 = vld [vmem:[%s962_s6] ss:$0 sm:$0xff]  ;;  %v714_v54 = vld [vmem:[#allocation4 + $0x28] sm:$0xff]   ;;  %v715_v57 = vld [vmem:[#allocation4 + $0x30] sm:$0xff]  }
  0x32   :  { %v716_v58 = vld [vmem:[#allocation4 + $0x38] sm:$0xff]   ;;  %v553_v59 = vld [vmem:[%s962_s6 + $0x1] ss:$0 sm:$0xff] }
  0x34   :  { %606 = vmatpush3.bf16.msra.mxu0 %v688_v4  ;;  %626 = vmatpush3.bf16.msra.mxu1 %v699_v13 }
  0x35   :  { %607 = vmatprep.subr.bf16.mxu0 %v769_v0  ;;  %627 = vmatprep.subr.bf16.mxu1 %v769_v0 }
  0x38   :  { %608 = vmatpush3.bf16.msra.mxu0 %v689_v7  ;;  %628 = vmatpush3.bf16.msra.mxu1 %v701_v18 }
  0x39   :  { %609 = vmatprep.subr.bf16.mxu0 %v769_v0  ;;  %629 = vmatprep.subr.bf16.mxu1 %v769_v0 }
  0x3c   :  { %610 = vmatpush3.bf16.msra.mxu0 %v690_v8  ;;  %630 = vmatpush3.bf16.msra.mxu1 %v703_v22 }
  0x3d   :  { %611 = vmatprep.subr.bf16.mxu0 %v769_v0  ;;  %631 = vmatprep.subr.bf16.mxu1 %v769_v0 }
  0x40   :  { %612 = vmatpush3.bf16.msra.mxu0 %v691_v14  ;;  %632 = vmatpush3.bf16.msra.mxu1 %v705_v25 }
  0x41   :  { %613 = vmatprep.subr.bf16.mxu0 %v769_v0  ;;  %633 = vmatprep.subr.bf16.mxu1 %v769_v0 }
  0x44   :  { %614 = vmatpush3.bf16.msra.mxu0 %v692_v19  ;;  %634 = vmatpush3.bf16.msra.mxu1 %v707_v32 }
  0x45   :  { %639 = vmatprep.subr.bf16.mxu0 %v769_v0  ;;  %659 = vmatprep.subr.bf16.mxu1 %v769_v0 }
  0x47   :  { %616 = vmatmul.mubr.bf16.vlgmr.msra.gmra.mrb[0].mxu0 %v72_v23  ;;  %636 = vmatmul.mubr.bf16.vlgmr.msra.gmra.mrb[0].mxu1 %v204_v35 }
  0x48   :  { %640 = vmatpush3.bf16.msra.mxu0 %v694_v24  ;;  %655 = vmatprep.mubr.msk.bf16.mxu0 %vm770_vm0, %v769_v0 }
  0x49   :  { %641 = vmatprep.subr.bf16.mxu0 %v769_v0  ;;  %675 = vmatprep.mubr.msk.bf16.mxu1 %vm770_vm0, %v769_v0 }
  0x4a   :  { %660 = vmatpush3.bf16.msra.mxu1 %v709_v37 }
  0x4b   :  { %661 = vmatprep.subr.bf16.mxu1 %v769_v0 }
  0x4c   :  { %642 = vmatpush3.bf16.msra.mxu0 %v696_v26 }
  0x4d   :  { %643 = vmatprep.subr.bf16.mxu0 %v769_v0 }
  0x4e   :  { %662 = vmatpush3.bf16.msra.mxu1 %v710_v38 }
  0x4f   :  { %663 = vmatprep.subr.bf16.mxu1 %v769_v0 }
  0x50   :  { %644 = vmatpush3.bf16.msra.mxu0 %v698_v27 }
  0x51   :  { %645 = vmatprep.subr.bf16.mxu0 %v769_v0 }
  0x52   :  { %664 = vmatpush3.bf16.msra.mxu1 %v711_v39 }
  0x53   :  { %665 = vmatprep.subr.bf16.mxu1 %v769_v0 }
  0x54   :  { %646 = vmatpush3.bf16.msra.mxu0 %v700_v28 }
  0x55   :  { %647 = vmatprep.subr.bf16.mxu0 %v769_v0 }
  0x56   :  { %666 = vmatpush3.bf16.msra.mxu1 %v712_v40 }
  0x57   :  { %667 = vmatprep.subr.bf16.mxu1 %v769_v0 }
  0x58   :  { %648 = vmatpush3.bf16.msra.mxu0 %v702_v29 }
  0x59   :  { %649 = vmatprep.subr.bf16.mxu0 %v769_v0 }
  0x5a   :  { %668 = vmatpush3.bf16.msra.mxu1 %v713_v41 }
  0x5b   :  { %669 = vmatprep.subr.bf16.mxu1 %v769_v0 }
  0x5c   :  { %650 = vmatpush3.bf16.msra.mxu0 %v704_v30 }
  0x5d   :  { %651 = vmatprep.subr.bf16.mxu0 %v769_v0 }
  0x5e   :  { %670 = vmatpush3.bf16.msra.mxu1 %v714_v54 }
  0x5f   :  { %671 = vmatprep.subr.bf16.mxu1 %v769_v0 }
  0x60   :  { %652 = vmatpush3.bf16.msra.mxu0 %v706_v31 }
  0x61   :  { %653 = vmatprep.subr.bf16.mxu0 %v769_v0 }
  0x62   :  { %672 = vmatpush3.bf16.msra.mxu1 %v715_v57 }
  0x63   :  { %673 = vmatprep.subr.bf16.mxu1 %v769_v0  ;;  %v554_v0 = vld [vmem:[%s962_s6 + $0x2] ss:$0 sm:$0xff] }
  0x64   :  { %654 = vmatpush3.bf16.msra.mxu0 %v708_v36 }
  0x66   :  { %674 = vmatpush3.bf16.msra.mxu1 %v716_v58 }
 0x11a   :  { %v175_v43 = vpop.f32.mrb[0].mxu0  ;;  %v303_v52 = vpop.f32.mrb[0].mxu1 }
 0x11b   :  { %v176_v44 = vadd.f32 %v528_v42, %v175_v43  ;;  %v617_v45 = vpop.f32.mrb[1].mxu0  ;;  %v637_v53 = vpop.f32.mrb[1].mxu1 }
 0x11c   :  { %v178_v46 = vpop.f32.mrb[2].mxu0  ;;  %v306_v55 = vpop.f32.mrb[2].mxu1 }
 0x11d   :  { %v179_v47 = vadd.f32 %v528_v42, %v178_v46  ;;  %v618_v48 = vpop.f32.mrb[3].mxu0  ;;  %v182_v49 = vmax.f32 %v176_v44, 0.0  ;;  %v638_v56 = vpop.f32.mrb[3].mxu1 }
 0x11f   :  { %v183_v50 = vmax.f32 %v179_v47, 0.0 }
 0x121   :  { %v185_v51 = vpack.c.bf16 %v183_v50, %v182_v49 }
 0x123   :  { %656 = vmatmul.mubr.bf16.vlgmr.msra.gmra.mrb[4].mxu0 %v185_v51 }
 0x1f6   :  { %v392_v60 = vpop.f32.mrb[4].mxu0 }
 0x1f7   :  { %v393_v61 = vadd.f32 %v392_v60, %v303_v52  ;;  %v657_v62 = vpop.f32.mrb[5].mxu0 }
 0x1f8   :  { %v395_v63 = vpop.f32.mrb[6].mxu0 }
 0x1f9   :  { %v403_v1 = vadd.f32 %v553_v59, %v393_v61  ;;  %v396_v2 = vadd.f32 %v395_v63, %v306_v55  ;;  %v658_v3 = vpop.f32.mrb[7].mxu0 }
 0x1fb   :  { %v404_v4 = vadd.f32 %v553_v59, %v396_v2  ;;  %v405_v5 = vmax.f32 %v403_v1, 0.0 }
 0x1fd   :  { %v406_v6 = vmax.f32 %v404_v4, 0.0 }
 0x1ff   :  { %v408_v7 = vpack.c.bf16 %v406_v6, %v405_v5 }
 0x201   :  { %676 = vmatmul.mubr.bf16.vlgmr.msra.gmra.mrb[4].mxu1 %v408_v7 }
 0x2d4   :  { %v511_v8 = vpop.f32.mrb[4].mxu1 }
 0x2d5   :  { %v512_v9 = vadd.f32 %v554_v0, %v511_v8  ;;  %v677_v10 = vpop.f32.mrb[5].mxu1 }
 0x2d6   :  { %v514_v11 = vpop.f32.mrb[6].mxu1 }
 0x2d7   :  { %518 = vst [vmem:[%s963_s7] sm:$0xff] %v512_v9  ;;  %v515_v12 = vadd.f32 %v554_v0, %v514_v11  ;;  %v678_v13 = vpop.f32.mrb[7].mxu1 }
 0x2d9   :  { %519 = vst [vmem:[%s963_s7 + $0x8] sm:$0xff] %v515_v12 }
 0x2da   :  { %524 = vsyncpa [#allocation3], 1 }
 0x2db   :  { %525 = vsyncpa [#allocation5], 1 }

</bundles_post_ra>
